<compile_context>
chip_gen: v7x
topology: tpu7x:2x2x1
jax: 0.10.0
libtpu: 0.0.40
codegen_flags: <defaults>
</compile_context>

<pallas_src>
import functools

import jax
import jax.numpy as jnp
from jax.experimental import pallas as pl
from jax.experimental.pallas import tpu as pltpu


def _focal_loss_kernel(logits_ref, targets_ref, out_ref, s_acc, k_acc,
                       *, batch_size, num_valid, hw, tile_hw):
    """Accumulates, per class c (lane-wide partials):
         S[c] = sum over pixels with target==c of -log_softmax(logits)[c]
         K[c] = count of pixels with target==c
       Epilogue: loss = (1/P) * sum_c (batch_size / K[c] if K[c] > 0 else 0) * S[c]
       == mean_p( -w[t_p] * log_softmax(logits_p)[t_p] )."""
    n = pl.program_id(0)
    j = pl.program_id(1)

    @pl.when(jnp.logical_and(n == 0, j == 0))
    def _():
        s_acc[...] = jnp.zeros_like(s_acc)
        k_acc[...] = jnp.zeros_like(k_acc)

    x = logits_ref[...].astype(jnp.float32)              # (C, tile_hw)
    t = targets_ref[...]                                  # (1, tile_hw) int32

    # log-softmax across the C sublane rows (C is small).
    m = jnp.max(x, axis=0, keepdims=True)                  # (1, tile_hw)
    lse = m + jnp.log(jnp.sum(jnp.exp(x - m), axis=0, keepdims=True))
    nll = lse - x                                           # -log_softmax, (C, tile_hw)

    cids = jax.lax.broadcasted_iota(jnp.int32, x.shape, 0)  # class id per row
    onehot = cids == t                                       # (C, tile_hw)

    # Mask pixels past the end of the image in a (possibly partial) last tile.
    pix = j * tile_hw + jax.lax.broadcasted_iota(jnp.int32, x.shape, 1)
    sel = jnp.logical_and(onehot, pix < hw)

    # Purely elementwise accumulation in the hot loop (no cross-lane reduce).
    s_acc[...] += jnp.where(sel, nll, 0.0)
    k_acc[...] += sel.astype(jnp.float32)

    @pl.when(jnp.logical_and(n == pl.num_programs(0) - 1,
                             j == pl.num_programs(1) - 1))
    def _():
        s = jnp.sum(s_acc[...], axis=1, keepdims=True)       # (C, 1)
        k = jnp.sum(k_acc[...], axis=1, keepdims=True)       # (C, 1)
        # Safe divide: no inf on the untaken branch.
        w = jnp.where(k > 0.0, batch_size / jnp.maximum(k, 1.0), 0.0)
        out_ref[...] = (jnp.sum(w * s) / num_valid).reshape(1, 1)


def focal_loss(inputs, targets, *, tile_hw=8192):
    """inputs: (N, C, H, W) float logits; targets: (N, H, W) integer class ids.
       Returns scalar f32 loss matching FocalLoss(alpha=None, gamma=2, 'mean')."""
    N, C, H, W = inputs.shape
    HW = H * W
    P = N * HW

    # Free contiguous reshapes -- no transpose, no pad, single HBM pass.
    logits = inputs.reshape(N, C, HW)
    tgt = targets.reshape(N, 1, HW).astype(jnp.int32)

    if HW <= tile_hw:
        tile = HW                                  # full-dim block (always legal)
    else:
        tile = max(128, (tile_hw // 128) * 128)    # lane-aligned tile
    grid_hw = pl.cdiv(HW, tile)

    kernel = functools.partial(
        _focal_loss_kernel, batch_size=float(N), num_valid=float(P),
        hw=HW, tile_hw=tile)

    out = pl.pallas_call(
        kernel,
        out_shape=jax.ShapeDtypeStruct((1, 1), jnp.float32),
        grid_spec=pltpu.PrefetchScalarGridSpec(
            num_scalar_prefetch=0,
            grid=(N, grid_hw),
            in_specs=[
                # Pixels on lanes, classes on sublanes; batch dim squeezed.
                pl.BlockSpec((None, C, tile), lambda n, j: (n, 0, j)),
                pl.BlockSpec((None, 1, tile), lambda n, j: (n, 0, j)),
            ],
            out_specs=pl.BlockSpec((1, 1), lambda n, j: (0, 0)),
            scratch_shapes=[
                pltpu.VMEM((C, tile), jnp.float32),   # S[c] lane-wide partials
                pltpu.VMEM((C, tile), jnp.float32),   # K[c] lane-wide partials
            ],
        ),
        compiler_params=pltpu.CompilerParams(
            dimension_semantics=("arbitrary", "arbitrary")),
    )(logits, tgt)

    # TODO(synk): alpha is not None branch (softmax focal modulation with
    # one-hot targets of the same shape as inputs) not implemented; the
    # module default alpha=None never takes it.
    # TODO(synk): on v7x (2 TensorCores) split the pixel grid across cores
    # with per-core S/K partial outputs combined in the wrapper.
    return out[0, 0]


def focal_loss_ref(inputs, targets):
    """Pure-JAX reference mirroring the PyTorch module (alpha=None, 'mean')."""
    N, C = inputs.shape[0], inputs.shape[1]
    t = targets.astype(jnp.int32)
    counts = jnp.stack([jnp.sum(t == i).astype(jnp.float32) for i in range(C)])
    weights = jnp.where(counts > 0, N / counts, 0.0)
    logp = jax.nn.log_softmax(inputs.astype(jnp.float32), axis=1)
    logp_t = jnp.take_along_axis(logp, t[:, None, :, :], axis=1)[:, 0]
    loss = -weights[t] * logp_t
    return loss.mean()


if __name__ == "__main__":
    key = jax.random.PRNGKey(0)
    kx, kt = jax.random.split(key)

    N, C, H, W = 2, 4, 16, 16
    x = jax.random.normal(kx, (N, C, H, W), dtype=jnp.float32)
    targets = jax.random.randint(kt, (N, H, W), 0, C, dtype=jnp.int32)

    loss = jax.block_until_ready(focal_loss(x, targets))
    ref = jax.block_until_ready(focal_loss_ref(x, targets))
    assert jnp.allclose(loss, ref, rtol=1e-5, atol=1e-5), (loss, ref)

    print("KERNEL_OK")
</pallas_src>

<mosaic_0001>
module attributes {stable_mosaic.version = 11 : i64} {
  func.func @_focal_loss_kernel(%arg0: i32, %arg1: i32, %arg2: memref<1x4x256xf32, #tpu.memory_space<vmem>>, %arg3: memref<1x1x256xi32, #tpu.memory_space<vmem>>, %arg4: memref<1x1xf32, #tpu.memory_space<vmem>>, %arg5: memref<4x256xf32, #tpu.memory_space<vmem>>, %arg6: memref<4x256xf32, #tpu.memory_space<vmem>>) attributes {dimension_semantics = [#tpu.dimension_semantics<arbitrary>, #tpu.dimension_semantics<arbitrary>], iteration_bounds = array<i64: 2, 1>, scalar_prefetch = 0 : i64, scratch_operands = 2 : i64, tpu.core_type = #tpu.core_type<tc>, window_params = [{transform_indices = @transform_0, window_bounds = array<i64: 1, 4, 256>}, {transform_indices = @transform_1, window_bounds = array<i64: 1, 1, 256>}, {pipeline_mode = #tpu.pipeline_mode<synchronous>, transform_indices = @transform_2, window_bounds = array<i64: 1, 1>}]} {
    %c0_i32 = arith.constant 0 : i32
    %0 = arith.cmpi eq, %arg0, %c0_i32 : i32
    %c0_i32_0 = arith.constant 0 : i32
    %1 = arith.cmpi eq, %arg1, %c0_i32_0 : i32
    %2 = arith.andi %0, %1 : i1
    %3 = arith.extui %2 : i1 to i32
    %c0_i32_1 = arith.constant 0 : i32
    %4 = arith.cmpi ne, %3, %c0_i32_1 : i32
    scf.if %4 {
      %cst_20 = arith.constant 0.000000e+00 : f32
      %45 = vector.broadcast %cst_20 : f32 to vector<4x256xf32>
      %c0_21 = arith.constant 0 : index
      %c0_22 = arith.constant 0 : index
      %46 = vector.load %arg5[%c0_21, %c0_22] : memref<4x256xf32, #tpu.memory_space<vmem>>, vector<4x256xf32>
      tpu.vector_store %arg5[%c0_21, %c0_22], %45 {strides = array<i32>} : memref<4x256xf32, #tpu.memory_space<vmem>>, vector<4x256xf32>,
      %cst_23 = arith.constant 0.000000e+00 : f32
      %47 = vector.broadcast %cst_23 : f32 to vector<4x256xf32>
      %c0_24 = arith.constant 0 : index
      %c0_25 = arith.constant 0 : index
      %48 = vector.load %arg6[%c0_24, %c0_25] : memref<4x256xf32, #tpu.memory_space<vmem>>, vector<4x256xf32>
      tpu.vector_store %arg6[%c0_24, %c0_25], %47 {strides = array<i32>} : memref<4x256xf32, #tpu.memory_space<vmem>>, vector<4x256xf32>,
    } else {
    }
    %c0 = arith.constant 0 : index
    %c0_2 = arith.constant 0 : index
    %c0_3 = arith.constant 0 : index
    %5 = vector.load %arg2[%c0, %c0_2, %c0_3] : memref<1x4x256xf32, #tpu.memory_space<vmem>>, vector<1x4x256xf32>
    %6 = vector.shape_cast %5 : vector<1x4x256xf32> to vector<4x256xf32>
    %c0_4 = arith.constant 0 : index
    %c0_5 = arith.constant 0 : index
    %c0_6 = arith.constant 0 : index
    %7 = vector.load %arg3[%c0_4, %c0_5, %c0_6] : memref<1x1x256xi32, #tpu.memory_space<vmem>>, vector<1x1x256xi32>
    %8 = vector.shape_cast %7 : vector<1x1x256xi32> to vector<1x256xi32>
    %cst = arith.constant dense<0xFF800000> : vector<256xf32>
    %9 = vector.multi_reduction <maximumf>, %6, %cst [0] : vector<4x256xf32> to vector<256xf32>
    %10 = vector.shape_cast %9 : vector<256xf32> to vector<1x256xf32>
    %11 = vector.broadcast %10 : vector<1x256xf32> to vector<4x256xf32>
    %12 = arith.subf %6, %11 : vector<4x256xf32>
    %13 = math.exp %12 : vector<4x256xf32>
    %cst_7 = arith.constant dense<0.000000e+00> : vector<256xf32>
    %14 = vector.multi_reduction <add>, %13, %cst_7 [0] : vector<4x256xf32> to vector<256xf32>
    %15 = vector.shape_cast %14 : vector<256xf32> to vector<1x256xf32>
    %16 = math.log %15 : vector<1x256xf32>
    %17 = arith.addf %10, %16 : vector<1x256xf32>
    %18 = vector.broadcast %17 : vector<1x256xf32> to vector<4x256xf32>
    %19 = arith.subf %18, %6 : vector<4x256xf32>
    %20 = tpu.iota {dimensions = array<i32: 0>} : vector<4x256xi32>
    %21 = vector.broadcast %8 : vector<1x256xi32> to vector<4x256xi32>
    %22 = arith.cmpi eq, %20, %21 : vector<4x256xi32>
    %c256_i32 = arith.constant 256 : i32
    %23 = arith.muli %arg1, %c256_i32 : i32
    %24 = tpu.iota {dimensions = array<i32: 1>} : vector<4x256xi32>
    %25 = vector.broadcast %23 : i32 to vector<4x256xi32>
    %26 = arith.addi %25, %24 : vector<4x256xi32>
    %c256_i32_8 = arith.constant 256 : i32
    %27 = vector.broadcast %c256_i32_8 : i32 to vector<4x256xi32>
    %28 = arith.cmpi slt, %26, %27 : vector<4x256xi32>
    %29 = arith.andi %22, %28 : vector<4x256xi1>
    %c0_9 = arith.constant 0 : index
    %c0_10 = arith.constant 0 : index
    %30 = vector.load %arg5[%c0_9, %c0_10] : memref<4x256xf32, #tpu.memory_space<vmem>>, vector<4x256xf32>
    %cst_11 = arith.constant 0.000000e+00 : f32
    %31 = vector.broadcast %cst_11 : f32 to vector<4x256xf32>
    %32 = arith.select %29, %19, %31 : vector<4x256xi1>, vector<4x256xf32>
    %33 = arith.addf %30, %32 : vector<4x256xf32>
    %c0_12 = arith.constant 0 : index
    %c0_13 = arith.constant 0 : index
    %34 = vector.load %arg5[%c0_12, %c0_13] : memref<4x256xf32, #tpu.memory_space<vmem>>, vector<4x256xf32>
    tpu.vector_store %arg5[%c0_12, %c0_13], %33 {strides = array<i32>} : memref<4x256xf32, #tpu.memory_space<vmem>>, vector<4x256xf32>,
    %c0_14 = arith.constant 0 : index
    %c0_15 = arith.constant 0 : index
    %35 = vector.load %arg6[%c0_14, %c0_15] : memref<4x256xf32, #tpu.memory_space<vmem>>, vector<4x256xf32>
    %36 = arith.extui %29 : vector<4x256xi1> to vector<4x256xi32>
    %37 = arith.sitofp %36 : vector<4x256xi32> to vector<4x256xf32>
    %38 = arith.addf %35, %37 : vector<4x256xf32>
    %c0_16 = arith.constant 0 : index
    %c0_17 = arith.constant 0 : index
    %39 = vector.load %arg6[%c0_16, %c0_17] : memref<4x256xf32, #tpu.memory_space<vmem>>, vector<4x256xf32>
    tpu.vector_store %arg6[%c0_16, %c0_17], %38 {strides = array<i32>} : memref<4x256xf32, #tpu.memory_space<vmem>>, vector<4x256xf32>,
    %c1_i32 = arith.constant 1 : i32
    %40 = arith.cmpi eq, %arg0, %c1_i32 : i32
    %c0_i32_18 = arith.constant 0 : i32
    %41 = arith.cmpi eq, %arg1, %c0_i32_18 : i32
    %42 = arith.andi %40, %41 : i1
    %43 = arith.extui %42 : i1 to i32
    %c0_i32_19 = arith.constant 0 : i32
    %44 = arith.cmpi ne, %43, %c0_i32_19 : i32
    scf.if %44 {
      %c0_20 = arith.constant 0 : index
      %c0_21 = arith.constant 0 : index
      %45 = vector.load %arg5[%c0_20, %c0_21] : memref<4x256xf32, #tpu.memory_space<vmem>>, vector<4x256xf32>
      %cst_22 = arith.constant dense<0.000000e+00> : vector<4xf32>
      %46 = vector.multi_reduction <add>, %45, %cst_22 [1] : vector<4x256xf32> to vector<4xf32>
      %47 = vector.shape_cast %46 : vector<4xf32> to vector<4x1xf32>
      %c0_23 = arith.constant 0 : index
      %c0_24 = arith.constant 0 : index
      %48 = vector.load %arg6[%c0_23, %c0_24] : memref<4x256xf32, #tpu.memory_space<vmem>>, vector<4x256xf32>
      %cst_25 = arith.constant dense<0.000000e+00> : vector<4xf32>
      %49 = vector.multi_reduction <add>, %48, %cst_25 [1] : vector<4x256xf32> to vector<4xf32>
      %50 = vector.shape_cast %49 : vector<4xf32> to vector<4x1xf32>
      %cst_26 = arith.constant 0.000000e+00 : f32
      %51 = vector.broadcast %cst_26 : f32 to vector<4x1xf32>
      %52 = arith.cmpf ogt, %50, %51 : vector<4x1xf32>
      %cst_27 = arith.constant 1.000000e+00 : f32
      %53 = vector.broadcast %cst_27 : f32 to vector<4x1xf32>
      %54 = arith.maximumf %50, %53 : vector<4x1xf32>
      %cst_28 = arith.constant 2.000000e+00 : f32
      %55 = vector.broadcast %cst_28 : f32 to vector<4x1xf32>
      %56 = arith.divf %55, %54 : vector<4x1xf32>
      %cst_29 = arith.constant 0.000000e+00 : f32
      %57 = vector.broadcast %cst_29 : f32 to vector<4x1xf32>
      %58 = arith.select %52, %56, %57 : vector<4x1xi1>, vector<4x1xf32>
      %59 = arith.mulf %58, %47 : vector<4x1xf32>
      %60 = vector.shape_cast %59 : vector<4x1xf32> to vector<1x4x1xf32>
      %cst_30 = arith.constant dense<0.000000e+00> : vector<1xf32>
      %61 = vector.multi_reduction <add>, %60, %cst_30 [1, 2] : vector<1x4x1xf32> to vector<1xf32>
      %62 = vector.shape_cast %61 : vector<1xf32> to vector<1x1x1xf32>
      %63 = vector.extract %62[0, 0, 0] : f32 from vector<1x1x1xf32>
      %cst_31 = arith.constant 5.120000e+02 : f32
      %64 = arith.divf %63, %cst_31 : f32
      %65 = vector.broadcast %64 : f32 to vector<1x1xf32>
      %c0_32 = arith.constant 0 : index
      %c0_33 = arith.constant 0 : index
      %66 = vector.load %arg4[%c0_32, %c0_33] : memref<1x1xf32, #tpu.memory_space<vmem>>, vector<1x1xf32>
      tpu.vector_store %arg4[%c0_32, %c0_33], %65 {strides = array<i32>} : memref<1x1xf32, #tpu.memory_space<vmem>>, vector<1x1xf32>,
    } else {
    }
    return
  }
  func.func @transform_0(%arg0: i32, %arg1: i32) -> (i32, i32, i32) {
    %c0_i32 = arith.constant 0 : i32
    %c0_i32_0 = arith.constant 0 : i32
    return %arg0, %c0_i32, %arg1 : i32, i32, i32
  }
  func.func @transform_1(%arg0: i32, %arg1: i32) -> (i32, i32, i32) {
    %c0_i32 = arith.constant 0 : i32
    %c0_i32_0 = arith.constant 0 : i32
    return %arg0, %c0_i32, %arg1 : i32, i32, i32
  }
  func.func @transform_2(%arg0: i32, %arg1: i32) -> (i32, i32) {
    %c0_i32 = arith.constant 0 : i32
    %c0_i32_0 = arith.constant 0 : i32
    %c0_i32_1 = arith.constant 0 : i32
    return %c0_i32, %c0_i32_0 : i32, i32
  }
}

</mosaic_0001>

<bundles_post_ra>
// kernel: tpu_custom_call.1
= control target key start
LH: loop header
LB: loop body
LE: loop exit
PB: predicated region body
PF: predicated region fallthrough
CT: control target
= control target key end

     0   :  { %7 = vsyncpa [#allocation5], 0  ;;  %s942_s0 = inlined_call_operand.hbm [shape: f32[2,4,256], index: 0, kind: input, shape index: {}]   ;;  %s943_s1 = inlined_call_operand.hbm [shape: s32[2,1,256], index: 1, kind: input, shape index: {}]   ;;  %s944_s2 = inlined_call_operand.hbm [shape: f32[1,1], index: 2, kind: output, shape index: {}]  }
   0x1   :  { %9 = vsyncpa [#allocation5 + $0x1], 0 }
   0x2   :  { %10 = vsyncpa [#allocation8], 0 }
   0x3   :  { %12 = vsyncpa [#allocation8 + $0x1], 0 }
   0x4   :  { %13 = vsyncpa [#allocation6], 0  ;;  %s724_s9 = smov 0   ;;  %s726_s10 = smov 0  }
   0x5   :  { %s728_s11 = smov 0   ;;  %s730_s12 = smov 0  }
   0x6   :  { %s732_s13 = smov 0   ;;  %s734_s14 = smov 0  }
   0x7 LB: > { %s452_s15 = sadd.s32 4294967295, %s702_s14   ;;  %s31_s16 = sadd.s32 1, %s698_s13  ;;  %s702_s14 = sphi %s734_s14, %s19_s14   ;;  %s698_s13 = sphi %s732_s13, %s959_s13   ;;  %s694_s12 = sphi %s730_s12, %s958_s12   ;;  %s690_s11 = sphi %s728_s11, %s957_s11   ;;  %s686_s10 = sphi %s726_s10, %s956_s10   ;;  %s682_s9 = sphi %s724_s9, %s955_s9  }
   0x8   : > { %p33_p0 = scmp.ge.s32.totalorder %s31_s16, 2  ;;  %s40_s17 = sadd.s32 1, %s690_s11 }
   0x9   : > { %p47_p1 = scmp.ne.s32.totalorder %s690_s11, %s686_s10  ;;  %p48_p2 = scmp.eq.s32.totalorder %s702_s14, 0 }
   0xa   : > { %s961_s16 = smov (%p33_p0, %s31_s16), 0  ;;  %p53_p4 = scmp.ne.s32.totalorder %s686_s10, %s682_s9 }
   0xb   : > { %p760_p3 = por %p48_p2, %p47_p1  ;;  %s35_s19 = ssub.s32 %s698_s13, %s961_s16 }
   0xc   : > { %p54_p5 = scmp.eq.s32.totalorder %s452_s15, 0  ;;  %p38_p6 = scmp.eq.s32.totalorder %s35_s19, 0 }
   0xd   : > { %p493_p8 = scmp.lt.s32.totalorder %s702_s14, 2  ;;  %s778_s22 = sand.u32 1, %s690_s11  }
   0xe   : > { %p769_p7 = por %p54_p5, %p53_p4  ;;  %s472_s23 = sshll.u32 %s698_s13, 7 }
   0xf   : > { %s775_s21 = scalar_select %p38_p6, %s690_s11, %s40_s17  }
  0x10   : > { %s947_s20 = scalar_select %p769_p7, 1, 0 }
  0x11   : > { %s455_s24 = sshll.u32 %s778_s22, 3  ;;  %s785_s27 = scalar_lea.hbm %s942_s0, %s472_s23 }
  0x12   : > { %s130_s28 = scalar_lea.vmem [#allocation4], %s455_s24  ;;  %p789_p9 = pnand %p493_p8, %p760_p3 }
  0x13   : > { %s140_s29 = sshll.u32 %s130_s28, 4  ;;  %s127_s3 = scalar_lea.sflag [#allocation5], %s778_s22  ;;  %s793_s29 = int_to_ptr.vmem [resolvable:$true] %s140_s29 }
  0x14   : > { %s558_s4 = scalar_lea.hbm %s785_s27, 128  ;;  %p560_p13 = pneg %p789_p9 }
  0x15   : > { %p559_p12 = scmp.ne.s32.totalorder %s785_s27, %s558_s4  ;;  %s563_s7 = scalar_lea.hbm %s942_s0, 256 }
  0x16   : > { %p564_p2 = scmp.lt.u32.totalorder %s785_s27, %s942_s0  ;;  %p565_p3 = scmp.lt.u32.totalorder %s563_s7, %s558_s4 }
  0x17   : > { %p561_p0 = pnand %p560_p13, %p559_p12  ;;  %p567_p5 = scmp.lt.u32.totalorder %s558_s4, %s785_s27 }
  0x18   : > { %p566_p4 = por %p565_p3, %p564_p2 }
  0x19   : > { %p562_p1 = pneg %p561_p0 }
  0x1a   : > { %p568_p6 = por %p567_p5, %p566_p4 }
  0x1c   : > { %p569_p8 = pnand %p568_p6, %p562_p1 }
  0x1e   : > { %572 = shalt.err (!%p569_p8)
}
  0x1f   : > { %s573_s17 = scalar_lea.vmem %s793_s29, 128  ;;  %s704_s18 = smov [#allocation4]  }
  0x20   : > { %p574_p12 = scmp.ne.s32.totalorder %s793_s29, %s573_s17  ;;  %s578_s19 = sshll.u32 %s704_s18, 4  ;;  %s579_s19 = int_to_ptr.vmem [resolvable:$false] %s578_s19 }
  0x21   : > { %s580_s23 = scalar_lea.vmem %s579_s19, 256  ;;  %p581_p11 = scmp.lt.s32.totalorder %s793_s29, %s579_s19 }
  0x22   : > { %p576_p0 = pnand %p574_p12, %p560_p13  ;;  %p582_p2 = scmp.lt.s32.totalorder %s580_s23, %s573_s17 }
  0x24   : > { %p577_p10 = pneg %p576_p0  ;;  %p583_p3 = por %p582_p2, %p581_p11 }
  0x26   : > { %p584_p4 = pnand %p583_p3, %p577_p10 }
  0x28   : > { %587 = shalt.err (!%p584_p4)
}
  0x29   : > { %489 = dma.hbm_to_vmem [thread:$0]  (!%p789_p9), %s785_s27, 128, %s793_s29, %s127_s3  }
  0x2a   : > { %p949_p1 = scmp.lt.s32.totalorder %s702_s14, 3  ;;  %p950_p5 = scmp.ge.s32.totalorder %s702_s14, 1 }
  0x2b   : > { %s458_s25 = sshll.u32 %s778_s22, 1  ;;  %s473_s26 = sshll.u32 %s698_s13, 5 }
  0x2c   : > { %p827_p6 = pnand %p950_p5, %p949_p1  ;;  %s836_s5 = scalar_lea.hbm %s943_s1, %s473_s26 }
  0x2d   : > { %s151_s6 = scalar_lea.vmem [#allocation7], %s458_s25  ;;  %s148_s27 = scalar_lea.sflag [#allocation8], %s778_s22 }
  0x2e   : > { %s951_s24 = scalar_select %p827_p6, 1, 0 }
  0x2f   : > { %s161_s7 = sshll.u32 %s151_s6, 4  ;;  %s588_s29 = scalar_lea.hbm %s836_s5, 32  ;;  %s162_s7 = int_to_ptr.vmem [resolvable:$true] %s161_s7 }
  0x30   : > { %p589_p10 = scmp.ne.s32.totalorder %s836_s5, %s588_s29  ;;  %s593_s9 = scalar_lea.hbm %s943_s1, 64 }
  0x31   : > { %p594_p12 = scmp.lt.u32.totalorder %s836_s5, %s943_s1  ;;  %p595_p0 = scmp.lt.u32.totalorder %s593_s9, %s588_s29 }
  0x32   : > { %p591_p11 = pnand %p589_p10, %p560_p13  ;;  %p597_p3 = scmp.lt.u32.totalorder %s588_s29, %s836_s5 }
  0x33   : > { %p596_p2 = por %p595_p0, %p594_p12 }
  0x34   : > { %p592_p8 = pneg %p591_p11 }
  0x35   : > { %p598_p4 = por %p597_p3, %p596_p2 }
  0x37   : > { %p599_p1 = pnand %p598_p4, %p592_p8 }
  0x39   : > { %602 = shalt.err (!%p599_p1)
}
  0x3a   : > { %s603_s22 = scalar_lea.vmem %s162_s7, 32  ;;  %s705_s19 = smov [#allocation7]  }
  0x3b   : > { %p604_p5 = scmp.ne.s32.totalorder %s162_s7, %s603_s22  ;;  %s608_s23 = sshll.u32 %s705_s19, 4  ;;  %s609_s23 = int_to_ptr.vmem [resolvable:$false] %s608_s23 }
  0x3c   : > { %s610_s25 = scalar_lea.vmem %s609_s23, 64  ;;  %p611_p7 = scmp.lt.s32.totalorder %s162_s7, %s609_s23 }
  0x3d   : > { %p606_p10 = pnand %p604_p5, %p560_p13  ;;  %p612_p6 = scmp.lt.s32.totalorder %s610_s25, %s603_s22 }
  0x3f   : > { %p607_p11 = pneg %p606_p10  ;;  %p613_p0 = por %p612_p6, %p611_p7 }
  0x41   : > { %p614_p12 = pnand %p613_p0, %p607_p11 }
  0x43   : > { %617 = shalt.err (!%p614_p12)
}
  0x44   : > { %492 = dma.hbm_to_vmem [thread:$0]  (!%p789_p9), %s836_s5, 32, %s162_s7, %s148_s27  }
  0x45   : > { %p952_p8 = scmp.ne.s32.totalorder %s951_s24, 0 }
  0x46   : > { %s172_s26 = sand.u32 (!%p952_p8), 1, %s686_s10   ;;  %p953_p13 = scmp.ne.s32.totalorder (!%p952_p8), %s947_s20, 0 }
  0x47   : > { %170 = sbr.rel (%p952_p8) target bundleno = 552 (0x228), region = 28  ;;  %s462_s28 = sshll.u32 (!%p952_p8), %s172_s26, 3 }
  0x48   : > { %s173_s4 = scalar_lea.sflag (!%p952_p8), [#allocation5], %s172_s26  ;;  %s176_s6 = scalar_lea.vmem (!%p952_p8), [#allocation4], %s462_s28 }
  0x4e   : > { %669 = dma.done.wait (%p953_p13), %s173_s4, 128  }
  0x4f   : > { %671 = vsyncadd (%p953_p13), %s173_s4, 4294967168  ;;  %s463_s29 = sshll.u32 %s172_s26, 1  ;;  %s182_s3 = scalar_lea.sflag [#allocation8], %s172_s26 }
  0x50   : > { %s185_s30 = scalar_lea.vmem [#allocation7], %s463_s29 }
  0x51   : > { %673 = dma.done.wait (%p953_p13), %s182_s3, 32  }
  0x52   : > { %675 = vsyncadd (%p953_p13), %s182_s3, 4294967264  ;;  %p208_p7 = scmp.eq.s32.totalorder %s694_s12, 0 }
  0x53   : > { %v706_v0 = vmov (%p208_p7), 0.0  }
  0x54   : > { %213 = sbr.rel (!%p208_p7) target bundleno = 91 (0x5b), region = 40  ;;  %214 = vst [vmem:[#allocation2] sm:$0xff] (%p208_p7), %v706_v0  ;;  %215 = vst [vmem:[#allocation3] sm:$0xff] (%p208_p7), %v706_v0 }
  0x5b PF: > { %v870_v1 = vld [vmem:[%s176_s6] sm:$0xff]  ;;  %vm221_vm0 = vcmask 1043456   ;;  %v268_v2 = vlaneseq  ;;  %p311_p9 = scmp.eq.s32.totalorder %s694_s12, 1  ;;  %v217_v7 = vld [vmem:[%s185_s30] sm:$0x3]  ;;  %v300_v19 = vld [vmem:[#allocation3] sm:$0xff] }
  0x5c   : > { %v874_v3 = vcombine.high %v870_v1, %v870_v1  ;;  %v222_v4 = vsel %vm221_vm0, %v870_v1, -inf  ;;  %v707_v20 = vmov 0.0   ;;  %v291_v58 = vld [vmem:[#allocation2] sm:$0xff]  ;;  %vm340_vm4 = vcmask (%p311_p9), 3072  }
  0x5d   : > { %v223_v5 = vrot.slane %v222_v4, 4  ;;  %v269_v6 = vshrl.u32 %v268_v2, 7  ;;  %vm355_vm5 = vcmask (%p311_p9), 0  }
  0x5e   : > { %v229_v8 = vsel %vm221_vm0, %v874_v3, -inf }
  0x5f   : > { %v224_v9 = vmax.f32 %v222_v4, %v223_v5  ;;  %v230_v10 = vrot.slane %v229_v8, 4  ;;  %v272_v11 = vsub.s32 0, %v269_v6  ;;  %v276_v12 = vsub.s32 1, %v269_v6 }
  0x61   : > { %v225_v13 = vrot.slane %v224_v9, 2  ;;  %v231_v14 = vmax.f32 %v229_v8, %v230_v10  ;;  %v273_v15 = vrot.slane %v217_v7, %v272_v11  ;;  %v277_v16 = vrot.slane %v217_v7, %v276_v12 }
  0x63   : > { %v226_v17 = vmax.f32 %v224_v9, %v225_v13  ;;  %v232_v18 = vrot.slane %v231_v14, 2  ;;  %vm278_vm1 = vcmp.eq.s32.totalorder %v269_v6, %v273_v15  ;;  %vm279_vm2 = vcmp.eq.s32.totalorder %v269_v6, %v277_v16 }
  0x64   : > { %v465_v21 = vsel %vm278_vm1, 1.0, %v707_v20  ;;  %v466_v22 = vsel %vm279_vm2, 1.0, %v707_v20 }
  0x65   : > { %v227_v23 = vrot.slane %v226_v17, 1  ;;  %v233_v24 = vmax.f32 %v231_v14, %v232_v18  ;;  %v307_v25 = vcombine.low %v465_v21, %v466_v22 }
  0x67   : > { %v228_v26 = vmax.f32 %v226_v17, %v227_v23  ;;  %v234_v27 = vrot.slane %v233_v24, 1  ;;  %v309_v28 = vadd.f32 %v307_v25, %v300_v19 }
  0x69   : > { %v235_v29 = vmax.f32 %v233_v24, %v234_v27  ;;  %310 = vst [vmem:[#allocation3] sm:$0xff] %v309_v28 }
  0x6b   : > { %v238_v30 = vcombine.low %v228_v26, %v235_v29 }
  0x6d   : > { %v240_v31 = vsub.f32 %v870_v1, %v238_v30 }
  0x6f   : > { %v241_v32 = vmul.f32 1.442695, %v240_v31 }
  0x70   : > { %v325_v62 = vld [vmem:[#allocation3] sm:$0xff] (%p311_p9) }
  0x71   : > { %548 = vpow2.f32 %v241_v32  ;;  %v327_v0 = vcombine.high (%p311_p9), %v325_v62, %v325_v62  ;;  %v329_v2 = vsel (%p311_p9), %vm221_vm0, %v325_v62, 0.0 }
  0x7b   : > { %v549_v33 = vpop.eup %548 }
  0x7c   : > { %v244_v34 = vcombine.high %v549_v33, %v549_v33  ;;  %v246_v35 = vsel %vm221_vm0, %v549_v33, 0.0 }
  0x7d   : > { %v247_v36 = vrot.slane %v246_v35, 4 }
  0x7e   : > { %v253_v37 = vsel %vm221_vm0, %v244_v34, 0.0 }
  0x7f   : > { %v248_v38 = vadd.f32 %v247_v36, %v246_v35  ;;  %v254_v39 = vrot.slane %v253_v37, 4 }
  0x81   : > { %v249_v40 = vrot.slane %v248_v38, 2  ;;  %v255_v41 = vadd.f32 %v254_v39, %v253_v37 }
  0x83   : > { %v250_v42 = vadd.f32 %v249_v40, %v248_v38  ;;  %v256_v43 = vrot.slane %v255_v41, 2 }
  0x85   : > { %v251_v44 = vrot.slane %v250_v42, 1  ;;  %v257_v45 = vadd.f32 %v256_v43, %v255_v41 }
  0x87   : > { %v252_v46 = vadd.f32 %v251_v44, %v250_v42  ;;  %v258_v47 = vrot.slane %v257_v45, 1 }
  0x89   : > { %v259_v48 = vadd.f32 %v258_v47, %v257_v45  ;;  %550 = vlog2.f32 %v252_v46 }
  0x8b   : > { %552 = vlog2.f32 %v259_v48 }
  0x93   : > { %v551_v49 = vpop.eup %550 }
  0x94   : > { %v261_v50 = vmul.f32 0.6931472, %v551_v49 }
  0x95   : > { %v553_v51 = vpop.eup %552 }
  0x96   : > { %v263_v52 = vmul.f32 0.6931472, %v553_v51  ;;  %v264_v53 = vadd.f32 %v261_v50, %v228_v26 }
  0x98   : > { %v265_v54 = vadd.f32 %v263_v52, %v235_v29  ;;  %v266_v55 = vsub.f32 %v264_v53, %v870_v1  ;;  %v330_v1 = vsel (%p311_p9), %vm221_vm0, %v327_v0, 0.0 }
  0x99   : > { %v331_v6 = vadd.f32 (%p311_p9), %v330_v1, %v329_v2 }
  0x9a   : > { %v267_v56 = vsub.f32 %v265_v54, %v874_v3  ;;  %v292_v57 = vsel %vm278_vm1, %v266_v55, 0.0 }
  0x9b   : > { %315 = sbr.rel (!%p311_p9) target bundleno = 527 (0x20f), region = 44  ;;  %332 = vadd.xlane.f32.xlu0 (%p311_p9), %v331_v6 }
  0x9c   : > { %v293_v59 = vsel %vm279_vm2, %v267_v56, 0.0 }
  0x9d   : > { %v296_v60 = vcombine.low %v292_v57, %v293_v59 }
  0x9f   : > { %v298_v61 = vadd.f32 %v296_v60, %v291_v58 }
  0xa1   : > { %299 = vst [vmem:[#allocation2] sm:$0xff] %v298_v61 }
  0xa8   : > { %v316_v63 = vld [vmem:[#allocation2] sm:$0xff] }
  0xa9   : > { %v318_v4 = vcombine.high %v316_v63, %v316_v63  ;;  %v320_v3 = vsel %vm221_vm0, %v316_v63, 0.0 }
  0xab   : > { %v321_v5 = vsel %vm221_vm0, %v318_v4, 0.0 }
  0xac   : > { %v322_v7 = vadd.f32 %v321_v5, %v320_v3 }
  0xae   : > { %323 = vadd.xlane.f32.xlu0 %v322_v7 }
 0x128   : > { %v333_v8 = vpop.xlane.xlu0 %332 }
 0x129   : > { %v335_v9 = vmax.f32 %v333_v8, 1.0  ;;  %vm334_vm3 = vcmp.gt.f32.partialorder %v333_v8, 0.0 }
 0x12b   : > { %556 = vrcp.f32 %v335_v9 }
 0x135   : > { %v557_v10 = vpop.eup %556 }
 0x136   : > { %v337_v11 = vmul.f32 2.0, %v557_v10 }
 0x138   : > { %v338_v13 = vsel %vm334_vm3, %v337_v11, 0.0 }
 0x13b   : > { %v324_v12 = vpop.xlane.xlu0 %323 }
 0x13c   : > { %v339_v14 = vmul.f32 %v338_v13, %v324_v12 }
 0x13e   : > { %v341_v15 = vsel %vm340_vm4, %v339_v14, 0.0 }
 0x13f   : > { %342 = vadd.xlane.f32.xlu1 %v341_v15 }
 0x1cc   : > { %v343_v16 = vpop.xlane.xlu1 %342 }
 0x1cd   : > { %v344_v17 = vrot.slane %v343_v16, 4 }
 0x1cf   : > { %v345_v18 = vadd.f32 %v344_v17, %v343_v16 }
 0x1d1   : > { %v346_v19 = vrot.slane %v345_v18, 2 }
 0x1d3   : > { %v347_v20 = vadd.f32 %v346_v19, %v345_v18 }
 0x1d5   : > { %v348_v21 = vrot.slane %v347_v20, 1 }
 0x1d7   : > { %v349_v22 = vadd.f32 %v348_v21, %v347_v20 }
 0x1d9   : > { %476 = vpush %v349_v22 }
 0x20a   : > { %s477_s12 = spop %476 }
 0x20b   : > { %s353_s20 = smul.f32 0.001953125, %s477_s12 }
 0x20d   : > { %v354_v23 = vstv %s353_s20 }
 0x20e   : > { %356 = vst.msk [vmem:[#allocation9] sm:$0x1] %vm355_vm5, %v354_v23 }
 0x20f PF: > { %p898_p6 = scmp.eq.s32.totalorder %s452_s15, 1  ;;  %s708_s5 = smov [#allocation9]  }
 0x210   : > { %s364_s7 = sshll.u32 %s708_s5, 4  ;;  %s365_s7 = int_to_ptr.vmem [resolvable:$true] %s364_s7 }
 0x211   : > { %s618_s27 = scalar_lea.vmem %s365_s7, 16  ;;  %s624_s8 = scalar_lea.vmem %s365_s7, 32 }
 0x212   : > { %p619_p2 = scmp.ne.s32.totalorder %s365_s7, %s618_s27  ;;  %p625_p1 = scmp.lt.s32.totalorder %s365_s7, %s365_s7 }
 0x213   : > { %p626_p5 = scmp.lt.s32.totalorder %s624_s8, %s618_s27 }
 0x214   : > { %p620_p3 = pnand %p619_p2, %p898_p6 }
 0x215   : > { %p627_p10 = por %p626_p5, %p625_p1 }
 0x216   : > { %p621_p4 = pneg %p620_p3 }
 0x218   : > { %p628_p11 = pnand %p627_p10, %p621_p4 }
 0x21a   : > { %631 = shalt.err (!%p628_p11)
}
 0x21b   : > { %s632_s17 = scalar_lea.hbm %s944_s2, 16 }
 0x21c   : > { %p633_p0 = scmp.ne.s32.totalorder %s944_s2, %s632_s17  ;;  %p638_p13 = scmp.lt.u32.totalorder %s632_s17, %s944_s2 }
 0x21e   : > { %p634_p12 = pnand %p633_p0, %p898_p6 }
 0x220   : > { %p635_p8 = pneg %p634_p12 }
 0x222   : > { %p640_p7 = pnand %p638_p13, %p635_p8 }
 0x224   : > { %643 = shalt.err (!%p640_p7)
}
 0x225   : > { %483 = dma.vmem_to_hbm [thread:$0]  (%p898_p6), %s365_s7, 16, %s944_s2, [#allocation6]  }
 0x226   : > { %677 = dma.done.wait (%p898_p6), [#allocation6], 16  }
 0x227   : > { %679 = vsyncadd (%p898_p6), [#allocation6], 4294967280 }
 0x228 PF: > { %s19_s14 = sadd.s32 1, %s702_s14   ;;  %s955_s9 = smov %s686_s10 }
 0x229   : > { %p16_p9 = scmp.ge.s32.totalorder %s19_s14, 4   ;;  %s956_s10 = smov %s690_s11 }
 0x22a   : > { %s957_s11 = smov %s775_s21  ;;  %s958_s12 = smov %s698_s13 }
 0x22b   : > { %s959_s13 = smov %s961_s16  ;;  %18 = sbr.rel (!%p16_p9) target bundleno = 7 (0x7), region = 86 }
 0x232   :  { %377 = vsyncpa [#allocation5], 1 }
 0x233   :  { %379 = vsyncpa [#allocation5 + $0x1], 1 }
 0x234   :  { %380 = vsyncpa [#allocation8], 1 }
 0x235   :  { %382 = vsyncpa [#allocation8 + $0x1], 1 }
 0x236   :  { %383 = vsyncpa [#allocation6], 1 }
 0x237   :  { %385 = vsyncpa [#allocation6 + $0x1], 1 }

</bundles_post_ra>
